<compile_context>
chip_gen: v7x
topology: tpu7x:2x2x1
jax: 0.10.0
libtpu: 0.0.40
codegen_flags: <defaults>
</compile_context>

<pallas_src>
import math

import jax
import jax.numpy as jnp
import numpy as np
from jax.experimental import pallas as pl
from jax.experimental.pallas import tpu as pltpu


# -----------------------------------------------------------------------------
# Kernel helpers (f32 element-wise math: LN / gelu / softmax stats)
# -----------------------------------------------------------------------------
def _gelu_new(x):
    # identical to the HuggingFace / OpenAI "new gelu"
    return 0.5 * x * (1.0 + jnp.tanh(
        math.sqrt(2.0 / math.pi) * (x + 0.044715 * x * x * x)))


def _layer_norm(h, g, b, eps=1e-5):
    mu = jnp.mean(h, axis=-1, keepdims=True)
    var = jnp.mean((h - mu) ** 2, axis=-1, keepdims=True)
    return (h - mu) * jax.lax.rsqrt(var + eps) * g + b


# -----------------------------------------------------------------------------
# Kernel: one full GPT2 transformer block for one batch row per grid step
# -----------------------------------------------------------------------------
def gpt2_block_kernel(x_ref, maskadd_ref,
                      w_attn_ref, b_attn_ref, w_aproj_ref, b_aproj_ref,
                      w_fc_ref, b_fc_ref, w_mproj_ref, b_mproj_ref,
                      ln1g_ref, ln1b_ref, ln2g_ref, ln2b_ref,
                      xout_ref, scores_ref):
    bf16 = jnp.bfloat16
    f32 = jnp.float32

    x = x_ref[0]                        # (S, D) f32
    mask_add = maskadd_ref[...]         # (S, S) f32, precomputed (1-mask)*-1e4

    S, D = x.shape
    H = scores_ref.shape[1]
    dk = D // H
    scale = 1.0 / math.sqrt(dk)

    # ---- ln_1 (f32) ----
    nx = _layer_norm(x, ln1g_ref[...], ln1b_ref[...])

    # ---- c_attn: one full-width (D, 3D) bf16 matmul, f32 accumulate ----
    qkv = jnp.dot(nx.astype(bf16), w_attn_ref[...],
                  preferred_element_type=f32) + b_attn_ref[...]
    qkv_b = qkv.astype(bf16)

    # Head split: stack the dk-wide column slices into (H, S, dk) so the
    # attention matmuls below are head-batched (no per-head MXU calls).
    def split_heads(t):                 # (S, D) -> (H, S, dk)
        return jnp.stack([t[:, h * dk:(h + 1) * dk] for h in range(H)], axis=0)

    qh = split_heads(qkv_b[:, 0 * D:1 * D])
    kh = split_heads(qkv_b[:, 1 * D:2 * D])
    vh = split_heads(qkv_b[:, 2 * D:3 * D])

    # ---- scaled dot-product attention, head-batched ----
    s = jnp.einsum("hqd,hkd->hqk", qh, kh,
                   preferred_element_type=f32) * scale       # (H, S, S) f32
    s = s + mask_add[None, :, :]

    # explicit softmax in f32; exp + reciprocal run on the EUP slot
    m = jnp.max(s, axis=-1, keepdims=True)
    p = jnp.exp(s - m)
    l = jnp.sum(p, axis=-1, keepdims=True)
    probs = p * pl.reciprocal(l, approx=True)                # (H, S, S) f32

    scores_ref[0] = probs.astype(scores_ref.dtype)           # bf16 writeback

    ctx = jnp.einsum("hqk,hkd->hqd", probs.astype(bf16), vh,
                     preferred_element_type=f32)             # (H, S, dk) f32

    # merge heads back to (S, D)
    attn_merged = jnp.concatenate([ctx[h] for h in range(H)], axis=-1)

    # ---- attention output projection + residual 1 ----
    a = jnp.dot(attn_merged.astype(bf16), w_aproj_ref[...],
                preferred_element_type=f32) + b_aproj_ref[...]
    x1 = x + a

    # ---- ln_2 + MLP (gelu_new in f32) + residual 2 ----
    nx2 = _layer_norm(x1, ln2g_ref[...], ln2b_ref[...])
    hmid = _gelu_new(jnp.dot(nx2.astype(bf16), w_fc_ref[...],
                             preferred_element_type=f32) + b_fc_ref[...])
    mlp = jnp.dot(hmid.astype(bf16), w_mproj_ref[...],
                  preferred_element_type=f32) + b_mproj_ref[...]

    xout_ref[0] = x1 + mlp
    # TODO(synk): for S >> 128, tile the sequence axis (flash-style q/kv tiles
    # with causal-tile skipping) instead of computing the full (S, S) scores.


# -----------------------------------------------------------------------------
# Wrapper: one pallas_call per transformer block
# -----------------------------------------------------------------------------
def _vmem_limit_bytes(S, D, Ff, H):
    """Explicit scoped-VMEM budget from actual block sizes (+ headroom)."""
    bf16, f32 = 2, 4
    weights = bf16 * (D * 3 * D + D * D + D * Ff + Ff * D)
    small = f32 * (3 * D + D + Ff + D + 4 * D) + f32 * S * S
    acts = f32 * S * D * 2 + bf16 * H * S * S
    need = 2 * (weights + small + acts)          # double-buffered pipeline
    return int(min(max(4 * need, 32 * 1024 * 1024), 64 * 1024 * 1024))


def gpt2_block_forward(x, mask_add, params, n_head):
    B, S, D = x.shape
    Ff = params["w_fc"].shape[1]

    # Weights / biases / LN params / mask are grid-invariant (index 0,0).
    rep = lambda shape: pl.BlockSpec(shape, lambda b: (0, 0))

    in_specs = [
        pl.BlockSpec((1, S, D), lambda b: (b, 0, 0)),        # x (per batch row)
        rep((S, S)),                                         # additive mask
        rep((D, 3 * D)), rep((1, 3 * D)),                    # c_attn W, b
        rep((D, D)),     rep((1, D)),                        # attn c_proj W, b
        rep((D, Ff)),    rep((1, Ff)),                       # mlp c_fc W, b
        rep((Ff, D)),    rep((1, D)),                        # mlp c_proj W, b
        rep((1, D)), rep((1, D)),                            # ln_1 gamma/beta
        rep((1, D)), rep((1, D)),                            # ln_2 gamma/beta
    ]
    out_specs = [
        pl.BlockSpec((1, S, D), lambda b: (b, 0, 0)),
        pl.BlockSpec((1, n_head, S, S), lambda b: (b, 0, 0, 0)),
    ]
    out_shape = [
        jax.ShapeDtypeStruct((B, S, D), jnp.float32),
        jax.ShapeDtypeStruct((B, n_head, S, S), jnp.bfloat16),   # bf16 scores
    ]

    return pl.pallas_call(
        gpt2_block_kernel,
        grid=(B,),
        in_specs=in_specs,
        out_specs=out_specs,
        out_shape=out_shape,
        compiler_params=pltpu.CompilerParams(
            dimension_semantics=("parallel",),
            vmem_limit_bytes=_vmem_limit_bytes(S, D, Ff, n_head)),
    )(x, mask_add,
      params["w_attn"], params["b_attn"],
      params["w_aproj"], params["b_aproj"],
      params["w_fc"], params["b_fc"],
      params["w_mproj"], params["b_mproj"],
      params["ln1_g"], params["ln1_b"],
      params["ln2_g"], params["ln2_b"])


def gpt2_decoder_forward(x, look_ahead_mask, layer_params, n_head):
    """Stack of transformer blocks; returns (x, [scores per layer])."""
    # Precompute the additive causal mask once (not per grid step / per layer).
    mask_add = ((1.0 - look_ahead_mask) * (-10000.0)).astype(jnp.float32)
    layers_attn_scores = []
    for p in layer_params:
        x, scores = gpt2_block_forward(x, mask_add, p, n_head)
        layers_attn_scores.append(scores)
    return x, layers_attn_scores


# -----------------------------------------------------------------------------
# Deterministic parameter init (matches the module's __init__ shapes)
#   matmul weights stored bf16; biases / LN params kept f32.
# -----------------------------------------------------------------------------
def make_block_params(key, d_model, dim_ff):
    k0, k1, k2, k3 = jax.random.split(key, 4)
    std = 0.02
    f32, bf16 = jnp.float32, jnp.bfloat16
    return {
        "w_attn":  (std * jax.random.normal(k0, (d_model, 3 * d_model), f32)).astype(bf16),
        "b_attn":  jnp.zeros((1, 3 * d_model), f32),
        "w_aproj": (std * jax.random.normal(k1, (d_model, d_model), f32)).astype(bf16),
        "b_aproj": jnp.zeros((1, d_model), f32),
        "w_fc":    (std * jax.random.normal(k2, (d_model, dim_ff), f32)).astype(bf16),
        "b_fc":    jnp.zeros((1, dim_ff), f32),
        "w_mproj": (std * jax.random.normal(k3, (dim_ff, d_model), f32)).astype(bf16),
        "b_mproj": jnp.zeros((1, d_model), f32),
        "ln1_g":   jnp.ones((1, d_model), f32),
        "ln1_b":   jnp.zeros((1, d_model), f32),
        "ln2_g":   jnp.ones((1, d_model), f32),
        "ln2_b":   jnp.zeros((1, d_model), f32),
    }


# -----------------------------------------------------------------------------
# Pure-JAX reference (same bf16 matmul / f32 elementwise recipe)
# -----------------------------------------------------------------------------
def ref_block(x, mask, p, n_head):
    bf16, f32 = jnp.bfloat16, jnp.float32
    B, S, D = x.shape
    dk = D // n_head

    def ln(h, g, b):
        mu = h.mean(-1, keepdims=True)
        var = ((h - mu) ** 2).mean(-1, keepdims=True)
        return (h - mu) / jnp.sqrt(var + 1e-5) * g + b

    def mm(a, w):
        return jnp.dot(a.astype(bf16), w, preferred_element_type=f32)

    nx = ln(x, p["ln1_g"], p["ln1_b"])
    qkv = mm(nx, p["w_attn"]) + p["b_attn"]
    q, k, v = jnp.split(qkv, 3, axis=-1)

    def split_heads(t):
        return t.reshape(B, S, n_head, dk).transpose(0, 2, 1, 3)

    q, k, v = split_heads(q), split_heads(k), split_heads(v)
    s = jnp.einsum("bhqd,bhkd->bhqk", q.astype(bf16), k.astype(bf16),
                   preferred_element_type=f32) / math.sqrt(dk)
    s = s + (1.0 - mask) * (-10000.0)
    s = jax.nn.softmax(s, axis=-1)
    out = jnp.einsum("bhqk,bhkd->bhqd", s.astype(bf16), v,
                     preferred_element_type=f32)
    out = out.transpose(0, 2, 1, 3).reshape(B, S, D)
    a = mm(out, p["w_aproj"]) + p["b_aproj"]
    x = x + a

    nx2 = ln(x, p["ln2_g"], p["ln2_b"])
    h = mm(nx2, p["w_fc"]) + p["b_fc"]
    h = 0.5 * h * (1.0 + jnp.tanh(math.sqrt(2.0 / math.pi)
                                  * (h + 0.044715 * h ** 3)))
    m = mm(h, p["w_mproj"]) + p["b_mproj"]
    return x + m, s


# -----------------------------------------------------------------------------
if __name__ == "__main__":
    # small, module-consistent shapes
    num_layers = 2
    d_model = 32
    num_heads = 4
    dim_feedforward = 4 * d_model   # module default
    B, S = 2, 8

    key = jax.random.PRNGKey(0)
    kx, *kls = jax.random.split(key, 1 + num_layers)

    x = jax.random.normal(kx, (B, S, d_model), jnp.float32)
    # causal look-ahead mask (1 = attend, 0 = masked), as the module expects
    look_ahead_mask = jnp.tril(jnp.ones((S, S), jnp.float32))

    layer_params = [make_block_params(k, d_model, dim_feedforward) for k in kls]

    # pure-JAX reference of the PyTorch forward
    xr = x
    ref_scores = []
    for p in layer_params:
        xr, sr = ref_block(xr, look_ahead_mask, p, num_heads)
        ref_scores.append(sr)

    # Pallas kernel
    out, scores_list = gpt2_decoder_forward(x, look_ahead_mask,
                                            layer_params, num_heads)
    out = jax.block_until_ready(out)
    scores_list = [jax.block_until_ready(s) for s in scores_list]

    for li in range(num_layers):
        got = np.asarray(scores_list[li]).astype(np.float32)     # bf16 output
        np.testing.assert_allclose(got, np.asarray(ref_scores[li]),
                                   atol=1e-2, rtol=1e-2)
    np.testing.assert_allclose(np.asarray(out), np.asarray(xr),
                               atol=5e-3, rtol=5e-3)

    assert out.shape == (B, S, d_model)
    assert all(s.shape == (B, num_heads, S, S) for s in scores_list)
    print("KERNEL_OK")
</pallas_src>

<mosaic_0001>
module attributes {stable_mosaic.version = 11 : i64} {
  func.func @gpt2_block_kernel(%arg0: i32, %arg1: memref<1x8x32xf32, #tpu.memory_space<vmem>>, %arg2: memref<8x8xf32, #tpu.memory_space<vmem>>, %arg3: memref<32x96xbf16, #tpu.memory_space<vmem>>, %arg4: memref<1x96xf32, #tpu.memory_space<vmem>>, %arg5: memref<32x32xbf16, #tpu.memory_space<vmem>>, %arg6: memref<1x32xf32, #tpu.memory_space<vmem>>, %arg7: memref<32x128xbf16, #tpu.memory_space<vmem>>, %arg8: memref<1x128xf32, #tpu.memory_space<vmem>>, %arg9: memref<128x32xbf16, #tpu.memory_space<vmem>>, %arg10: memref<1x32xf32, #tpu.memory_space<vmem>>, %arg11: memref<1x32xf32, #tpu.memory_space<vmem>>, %arg12: memref<1x32xf32, #tpu.memory_space<vmem>>, %arg13: memref<1x32xf32, #tpu.memory_space<vmem>>, %arg14: memref<1x32xf32, #tpu.memory_space<vmem>>, %arg15: memref<1x8x32xf32, #tpu.memory_space<vmem>>, %arg16: memref<1x4x8x8xbf16, #tpu.memory_space<vmem>>) attributes {dimension_semantics = [#tpu.dimension_semantics<parallel>], iteration_bounds = array<i64: 2>, scalar_prefetch = 0 : i64, scratch_operands = 0 : i64, tpu.core_type = #tpu.core_type<tc>, window_params = [{transform_indices = @transform_0, window_bounds = array<i64: 1, 8, 32>}, {pipeline_mode = #tpu.pipeline_mode<synchronous>, transform_indices = @transform_1, window_bounds = array<i64: 8, 8>}, {pipeline_mode = #tpu.pipeline_mode<synchronous>, transform_indices = @transform_2, window_bounds = array<i64: 32, 96>}, {pipeline_mode = #tpu.pipeline_mode<synchronous>, transform_indices = @transform_3, window_bounds = array<i64: 1, 96>}, {pipeline_mode = #tpu.pipeline_mode<synchronous>, transform_indices = @transform_4, window_bounds = array<i64: 32, 32>}, {pipeline_mode = #tpu.pipeline_mode<synchronous>, transform_indices = @transform_5, window_bounds = array<i64: 1, 32>}, {pipeline_mode = #tpu.pipeline_mode<synchronous>, transform_indices = @transform_6, window_bounds = array<i64: 32, 128>}, {pipeline_mode = #tpu.pipeline_mode<synchronous>, transform_indices = @transform_7, window_bounds = array<i64: 1, 128>}, {pipeline_mode = #tpu.pipeline_mode<synchronous>, transform_indices = @transform_8, window_bounds = array<i64: 128, 32>}, {pipeline_mode = #tpu.pipeline_mode<synchronous>, transform_indices = @transform_9, window_bounds = array<i64: 1, 32>}, {pipeline_mode = #tpu.pipeline_mode<synchronous>, transform_indices = @transform_10, window_bounds = array<i64: 1, 32>}, {pipeline_mode = #tpu.pipeline_mode<synchronous>, transform_indices = @transform_11, window_bounds = array<i64: 1, 32>}, {pipeline_mode = #tpu.pipeline_mode<synchronous>, transform_indices = @transform_12, window_bounds = array<i64: 1, 32>}, {pipeline_mode = #tpu.pipeline_mode<synchronous>, transform_indices = @transform_13, window_bounds = array<i64: 1, 32>}, {transform_indices = @transform_14, window_bounds = array<i64: 1, 8, 32>}, {transform_indices = @transform_15, window_bounds = array<i64: 1, 4, 8, 8>}]} {
    %c0 = arith.constant 0 : index
    %c0_0 = arith.constant 0 : index
    %c0_1 = arith.constant 0 : index
    %0 = vector.load %arg1[%c0, %c0_0, %c0_1] : memref<1x8x32xf32, #tpu.memory_space<vmem>>, vector<1x8x32xf32>
    %1 = vector.shape_cast %0 : vector<1x8x32xf32> to vector<8x32xf32>
    %c0_2 = arith.constant 0 : index
    %c0_3 = arith.constant 0 : index
    %2 = vector.load %arg2[%c0_2, %c0_3] : memref<8x8xf32, #tpu.memory_space<vmem>>, vector<8x8xf32>
    %c0_4 = arith.constant 0 : index
    %c0_5 = arith.constant 0 : index
    %3 = vector.load %arg11[%c0_4, %c0_5] : memref<1x32xf32, #tpu.memory_space<vmem>>, vector<1x32xf32>
    %c0_6 = arith.constant 0 : index
    %c0_7 = arith.constant 0 : index
    %4 = vector.load %arg12[%c0_6, %c0_7] : memref<1x32xf32, #tpu.memory_space<vmem>>, vector<1x32xf32>
    %cst = arith.constant dense<0.000000e+00> : vector<8xf32>
    %5 = vector.multi_reduction <add>, %1, %cst [1] : vector<8x32xf32> to vector<8xf32>
    %6 = vector.shape_cast %5 : vector<8xf32> to vector<8x1xf32>
    %cst_8 = arith.constant 3.200000e+01 : f32
    %7 = vector.broadcast %cst_8 : f32 to vector<8x1xf32>
    %8 = arith.divf %6, %7 : vector<8x1xf32>
    %9 = vector.broadcast %8 : vector<8x1xf32> to vector<8x32xf32>
    %10 = arith.subf %1, %9 : vector<8x32xf32>
    %11 = arith.mulf %10, %10 : vector<8x32xf32>
    %cst_9 = arith.constant dense<0.000000e+00> : vector<8xf32>
    %12 = vector.multi_reduction <add>, %11, %cst_9 [1] : vector<8x32xf32> to vector<8xf32>
    %13 = vector.shape_cast %12 : vector<8xf32> to vector<8x1xf32>
    %cst_10 = arith.constant 3.200000e+01 : f32
    %14 = vector.broadcast %cst_10 : f32 to vector<8x1xf32>
    %15 = arith.divf %13, %14 : vector<8x1xf32>
    %16 = vector.broadcast %8 : vector<8x1xf32> to vector<8x32xf32>
    %17 = arith.subf %1, %16 : vector<8x32xf32>
    %cst_11 = arith.constant 9.99999974E-6 : f32
    %18 = vector.broadcast %cst_11 : f32 to vector<8x1xf32>
    %19 = arith.addf %15, %18 : vector<8x1xf32>
    %20 = math.rsqrt %19 : vector<8x1xf32>
    %21 = vector.broadcast %20 : vector<8x1xf32> to vector<8x32xf32>
    %22 = arith.mulf %17, %21 : vector<8x32xf32>
    %23 = vector.broadcast %3 : vector<1x32xf32> to vector<8x32xf32>
    %24 = arith.mulf %22, %23 : vector<8x32xf32>
    %25 = vector.broadcast %4 : vector<1x32xf32> to vector<8x32xf32>
    %26 = arith.addf %24, %25 : vector<8x32xf32>
    %27 = arith.truncf %26 : vector<8x32xf32> to vector<8x32xbf16>
    %c0_12 = arith.constant 0 : index
    %c0_13 = arith.constant 0 : index
    %28 = vector.load %arg3[%c0_12, %c0_13] : memref<32x96xbf16, #tpu.memory_space<vmem>>, vector<32x96xbf16>
    %cst_14 = arith.constant dense<0.000000e+00> : vector<8x96xf32>
    %29 = tpu.matmul %27, %28, %cst_14 {dimension_numbers = #tpu.dot_dimension_numbers<[1], [0], [0], [1], [0, 0, 1, 1], [], []>} : vector<8x32xbf16>, vector<32x96xbf16>, vector<8x96xf32> -> vector<8x96xf32>
    %c0_15 = arith.constant 0 : index
    %c0_16 = arith.constant 0 : index
    %30 = vector.load %arg4[%c0_15, %c0_16] : memref<1x96xf32, #tpu.memory_space<vmem>>, vector<1x96xf32>
    %31 = vector.broadcast %30 : vector<1x96xf32> to vector<8x96xf32>
    %32 = arith.addf %29, %31 : vector<8x96xf32>
    %33 = arith.truncf %32 : vector<8x96xf32> to vector<8x96xbf16>
    %34 = vector.extract_strided_slice %33 {offsets = [0, 0], sizes = [8, 32], strides = [1, 1]} : vector<8x96xbf16> to vector<8x32xbf16>
    %35 = vector.extract_strided_slice %34 {offsets = [0, 0], sizes = [8, 8], strides = [1, 1]} : vector<8x32xbf16> to vector<8x8xbf16>
    %36 = vector.extract_strided_slice %34 {offsets = [0, 8], sizes = [8, 8], strides = [1, 1]} : vector<8x32xbf16> to vector<8x8xbf16>
    %37 = vector.extract_strided_slice %34 {offsets = [0, 16], sizes = [8, 8], strides = [1, 1]} : vector<8x32xbf16> to vector<8x8xbf16>
    %38 = vector.extract_strided_slice %34 {offsets = [0, 24], sizes = [8, 8], strides = [1, 1]} : vector<8x32xbf16> to vector<8x8xbf16>
    %39 = vector.shape_cast %35 : vector<8x8xbf16> to vector<1x8x8xbf16>
    %40 = vector.shape_cast %36 : vector<8x8xbf16> to vector<1x8x8xbf16>
    %41 = vector.shape_cast %37 : vector<8x8xbf16> to vector<1x8x8xbf16>
    %42 = vector.shape_cast %38 : vector<8x8xbf16> to vector<1x8x8xbf16>
    %43 = tpu.concatenate %39, %40, %41, %42 in 0 : vector<1x8x8xbf16>, vector<1x8x8xbf16>, vector<1x8x8xbf16>, vector<1x8x8xbf16> -> vector<4x8x8xbf16>
    %44 = vector.extract_strided_slice %33 {offsets = [0, 32], sizes = [8, 32], strides = [1, 1]} : vector<8x96xbf16> to vector<8x32xbf16>
    %45 = vector.extract_strided_slice %44 {offsets = [0, 0], sizes = [8, 8], strides = [1, 1]} : vector<8x32xbf16> to vector<8x8xbf16>
    %46 = vector.extract_strided_slice %44 {offsets = [0, 8], sizes = [8, 8], strides = [1, 1]} : vector<8x32xbf16> to vector<8x8xbf16>
    %47 = vector.extract_strided_slice %44 {offsets = [0, 16], sizes = [8, 8], strides = [1, 1]} : vector<8x32xbf16> to vector<8x8xbf16>
    %48 = vector.extract_strided_slice %44 {offsets = [0, 24], sizes = [8, 8], strides = [1, 1]} : vector<8x32xbf16> to vector<8x8xbf16>
    %49 = vector.shape_cast %45 : vector<8x8xbf16> to vector<1x8x8xbf16>
    %50 = vector.shape_cast %46 : vector<8x8xbf16> to vector<1x8x8xbf16>
    %51 = vector.shape_cast %47 : vector<8x8xbf16> to vector<1x8x8xbf16>
    %52 = vector.shape_cast %48 : vector<8x8xbf16> to vector<1x8x8xbf16>
    %53 = tpu.concatenate %49, %50, %51, %52 in 0 : vector<1x8x8xbf16>, vector<1x8x8xbf16>, vector<1x8x8xbf16>, vector<1x8x8xbf16> -> vector<4x8x8xbf16>
    %54 = vector.extract_strided_slice %33 {offsets = [0, 64], sizes = [8, 32], strides = [1, 1]} : vector<8x96xbf16> to vector<8x32xbf16>
    %55 = vector.extract_strided_slice %54 {offsets = [0, 0], sizes = [8, 8], strides = [1, 1]} : vector<8x32xbf16> to vector<8x8xbf16>
    %56 = vector.extract_strided_slice %54 {offsets = [0, 8], sizes = [8, 8], strides = [1, 1]} : vector<8x32xbf16> to vector<8x8xbf16>
    %57 = vector.extract_strided_slice %54 {offsets = [0, 16], sizes = [8, 8], strides = [1, 1]} : vector<8x32xbf16> to vector<8x8xbf16>
    %58 = vector.extract_strided_slice %54 {offsets = [0, 24], sizes = [8, 8], strides = [1, 1]} : vector<8x32xbf16> to vector<8x8xbf16>
    %59 = vector.shape_cast %55 : vector<8x8xbf16> to vector<1x8x8xbf16>
    %60 = vector.shape_cast %56 : vector<8x8xbf16> to vector<1x8x8xbf16>
    %61 = vector.shape_cast %57 : vector<8x8xbf16> to vector<1x8x8xbf16>
    %62 = vector.shape_cast %58 : vector<8x8xbf16> to vector<1x8x8xbf16>
    %63 = tpu.concatenate %59, %60, %61, %62 in 0 : vector<1x8x8xbf16>, vector<1x8x8xbf16>, vector<1x8x8xbf16>, vector<1x8x8xbf16> -> vector<4x8x8xbf16>
    "tpu.trace_start"() <{level = 10 : i32, message = "hqd,hkd->hqk"}> : () -> ()
    %cst_17 = arith.constant dense<0.000000e+00> : vector<4x8x8xf32>
    %64 = tpu.matmul %43, %53, %cst_17 {dimension_numbers = #tpu.dot_dimension_numbers<[2], [2], [1], [1], [0, 0, 0, 1, 1, 1], [0], [0]>} : vector<4x8x8xbf16>, vector<4x8x8xbf16>, vector<4x8x8xf32> -> vector<4x8x8xf32>
    "tpu.trace_stop"() : () -> ()
    %cst_18 = arith.constant 0.353553385 : f32
    %65 = vector.broadcast %cst_18 : f32 to vector<4x8x8xf32>
    %66 = arith.mulf %64, %65 : vector<4x8x8xf32>
    %67 = vector.shape_cast %2 : vector<8x8xf32> to vector<1x8x8xf32>
    %68 = vector.broadcast %67 : vector<1x8x8xf32> to vector<4x8x8xf32>
    %69 = arith.addf %66, %68 : vector<4x8x8xf32>
    %cst_19 = arith.constant dense<0xFF800000> : vector<4x8xf32>
    %70 = vector.multi_reduction <maximumf>, %69, %cst_19 [2] : vector<4x8x8xf32> to vector<4x8xf32>
    %71 = vector.shape_cast %70 : vector<4x8xf32> to vector<4x8x1xf32>
    %72 = vector.broadcast %71 : vector<4x8x1xf32> to vector<4x8x8xf32>
    %73 = arith.subf %69, %72 : vector<4x8x8xf32>
    %74 = math.exp %73 : vector<4x8x8xf32>
    %cst_20 = arith.constant dense<0.000000e+00> : vector<4x8xf32>
    %75 = vector.multi_reduction <add>, %74, %cst_20 [2] : vector<4x8x8xf32> to vector<4x8xf32>
    %76 = vector.shape_cast %75 : vector<4x8xf32> to vector<4x8x1xf32>
    %77 = tpu.reciprocal %76 {approx = true} : vector<4x8x1xf32> -> vector<4x8x1xf32>
    %78 = vector.broadcast %77 : vector<4x8x1xf32> to vector<4x8x8xf32>
    %79 = arith.mulf %74, %78 : vector<4x8x8xf32>
    %80 = arith.truncf %79 : vector<4x8x8xf32> to vector<4x8x8xbf16>
    %c0_21 = arith.constant 0 : index
    %c0_22 = arith.constant 0 : index
    %c0_23 = arith.constant 0 : index
    %c0_24 = arith.constant 0 : index
    %81 = vector.load %arg16[%c0_21, %c0_22, %c0_23, %c0_24] : memref<1x4x8x8xbf16, #tpu.memory_space<vmem>>, vector<1x4x8x8xbf16>
    %82 = vector.shape_cast %81 : vector<1x4x8x8xbf16> to vector<4x8x8xbf16>
    %83 = vector.shape_cast %80 : vector<4x8x8xbf16> to vector<1x4x8x8xbf16>
    tpu.vector_store %arg16[%c0_21, %c0_22, %c0_23, %c0_24], %83 {strides = array<i32>} : memref<1x4x8x8xbf16, #tpu.memory_space<vmem>>, vector<1x4x8x8xbf16>,
    %84 = arith.truncf %79 : vector<4x8x8xf32> to vector<4x8x8xbf16>
    "tpu.trace_start"() <{level = 10 : i32, message = "hqk,hkd->hqd"}> : () -> ()
    %cst_25 = arith.constant dense<0.000000e+00> : vector<4x8x8xf32>
    %85 = tpu.matmul %84, %63, %cst_25 {dimension_numbers = #tpu.dot_dimension_numbers<[2], [1], [1], [2], [0, 0, 0, 1, 1, 2], [0], [0]>} : vector<4x8x8xbf16>, vector<4x8x8xbf16>, vector<4x8x8xf32> -> vector<4x8x8xf32>
    "tpu.trace_stop"() : () -> ()
    %86 = vector.extract_strided_slice %85 {offsets = [0, 0, 0], sizes = [1, 8, 8], strides = [1, 1, 1]} : vector<4x8x8xf32> to vector<1x8x8xf32>
    %87 = vector.shape_cast %86 : vector<1x8x8xf32> to vector<8x8xf32>
    %88 = vector.extract_strided_slice %85 {offsets = [1, 0, 0], sizes = [1, 8, 8], strides = [1, 1, 1]} : vector<4x8x8xf32> to vector<1x8x8xf32>
    %89 = vector.shape_cast %88 : vector<1x8x8xf32> to vector<8x8xf32>
    %90 = vector.extract_strided_slice %85 {offsets = [2, 0, 0], sizes = [1, 8, 8], strides = [1, 1, 1]} : vector<4x8x8xf32> to vector<1x8x8xf32>
    %91 = vector.shape_cast %90 : vector<1x8x8xf32> to vector<8x8xf32>
    %92 = vector.extract_strided_slice %85 {offsets = [3, 0, 0], sizes = [1, 8, 8], strides = [1, 1, 1]} : vector<4x8x8xf32> to vector<1x8x8xf32>
    %93 = vector.shape_cast %92 : vector<1x8x8xf32> to vector<8x8xf32>
    %94 = tpu.concatenate %87, %89, %91, %93 in 1 : vector<8x8xf32>, vector<8x8xf32>, vector<8x8xf32>, vector<8x8xf32> -> vector<8x32xf32>
    %95 = arith.truncf %94 : vector<8x32xf32> to vector<8x32xbf16>
    %c0_26 = arith.constant 0 : index
    %c0_27 = arith.constant 0 : index
    %96 = vector.load %arg5[%c0_26, %c0_27] : memref<32x32xbf16, #tpu.memory_space<vmem>>, vector<32x32xbf16>
    %cst_28 = arith.constant dense<0.000000e+00> : vector<8x32xf32>
    %97 = tpu.matmul %95, %96, %cst_28 {dimension_numbers = #tpu.dot_dimension_numbers<[1], [0], [0], [1], [0, 0, 1, 1], [], []>} : vector<8x32xbf16>, vector<32x32xbf16>, vector<8x32xf32> -> vector<8x32xf32>
    %c0_29 = arith.constant 0 : index
    %c0_30 = arith.constant 0 : index
    %98 = vector.load %arg6[%c0_29, %c0_30] : memref<1x32xf32, #tpu.memory_space<vmem>>, vector<1x32xf32>
    %99 = vector.broadcast %98 : vector<1x32xf32> to vector<8x32xf32>
    %100 = arith.addf %97, %99 : vector<8x32xf32>
    %101 = arith.addf %1, %100 : vector<8x32xf32>
    %c0_31 = arith.constant 0 : index
    %c0_32 = arith.constant 0 : index
    %102 = vector.load %arg13[%c0_31, %c0_32] : memref<1x32xf32, #tpu.memory_space<vmem>>, vector<1x32xf32>
    %c0_33 = arith.constant 0 : index
    %c0_34 = arith.constant 0 : index
    %103 = vector.load %arg14[%c0_33, %c0_34] : memref<1x32xf32, #tpu.memory_space<vmem>>, vector<1x32xf32>
    %cst_35 = arith.constant dense<0.000000e+00> : vector<8xf32>
    %104 = vector.multi_reduction <add>, %101, %cst_35 [1] : vector<8x32xf32> to vector<8xf32>
    %105 = vector.shape_cast %104 : vector<8xf32> to vector<8x1xf32>
    %cst_36 = arith.constant 3.200000e+01 : f32
    %106 = vector.broadcast %cst_36 : f32 to vector<8x1xf32>
    %107 = arith.divf %105, %106 : vector<8x1xf32>
    %108 = vector.broadcast %107 : vector<8x1xf32> to vector<8x32xf32>
    %109 = arith.subf %101, %108 : vector<8x32xf32>
    %110 = arith.mulf %109, %109 : vector<8x32xf32>
    %cst_37 = arith.constant dense<0.000000e+00> : vector<8xf32>
    %111 = vector.multi_reduction <add>, %110, %cst_37 [1] : vector<8x32xf32> to vector<8xf32>
    %112 = vector.shape_cast %111 : vector<8xf32> to vector<8x1xf32>
    %cst_38 = arith.constant 3.200000e+01 : f32
    %113 = vector.broadcast %cst_38 : f32 to vector<8x1xf32>
    %114 = arith.divf %112, %113 : vector<8x1xf32>
    %115 = vector.broadcast %107 : vector<8x1xf32> to vector<8x32xf32>
    %116 = arith.subf %101, %115 : vector<8x32xf32>
    %cst_39 = arith.constant 9.99999974E-6 : f32
    %117 = vector.broadcast %cst_39 : f32 to vector<8x1xf32>
    %118 = arith.addf %114, %117 : vector<8x1xf32>
    %119 = math.rsqrt %118 : vector<8x1xf32>
    %120 = vector.broadcast %119 : vector<8x1xf32> to vector<8x32xf32>
    %121 = arith.mulf %116, %120 : vector<8x32xf32>
    %122 = vector.broadcast %102 : vector<1x32xf32> to vector<8x32xf32>
    %123 = arith.mulf %121, %122 : vector<8x32xf32>
    %124 = vector.broadcast %103 : vector<1x32xf32> to vector<8x32xf32>
    %125 = arith.addf %123, %124 : vector<8x32xf32>
    %126 = arith.truncf %125 : vector<8x32xf32> to vector<8x32xbf16>
    %c0_40 = arith.constant 0 : index
    %c0_41 = arith.constant 0 : index
    %127 = vector.load %arg7[%c0_40, %c0_41] : memref<32x128xbf16, #tpu.memory_space<vmem>>, vector<32x128xbf16>
    %cst_42 = arith.constant dense<0.000000e+00> : vector<8x128xf32>
    %128 = tpu.matmul %126, %127, %cst_42 {dimension_numbers = #tpu.dot_dimension_numbers<[1], [0], [0], [1], [0, 0, 1, 1], [], []>} : vector<8x32xbf16>, vector<32x128xbf16>, vector<8x128xf32> -> vector<8x128xf32>
    %c0_43 = arith.constant 0 : index
    %c0_44 = arith.constant 0 : index
    %129 = vector.load %arg8[%c0_43, %c0_44] : memref<1x128xf32, #tpu.memory_space<vmem>>, vector<1x128xf32>
    %130 = vector.broadcast %129 : vector<1x128xf32> to vector<8x128xf32>
    %131 = arith.addf %128, %130 : vector<8x128xf32>
    %cst_45 = arith.constant 5.000000e-01 : f32
    %132 = vector.broadcast %cst_45 : f32 to vector<8x128xf32>
    %133 = arith.mulf %132, %131 : vector<8x128xf32>
    %cst_46 = arith.constant 4.471500e-02 : f32
    %134 = vector.broadcast %cst_46 : f32 to vector<8x128xf32>
    %135 = arith.mulf %134, %131 : vector<8x128xf32>
    %136 = arith.mulf %135, %131 : vector<8x128xf32>
    %137 = arith.mulf %136, %131 : vector<8x128xf32>
    %138 = arith.addf %131, %137 : vector<8x128xf32>
    %cst_47 = arith.constant 0.797884583 : f32
    %139 = vector.broadcast %cst_47 : f32 to vector<8x128xf32>
    %140 = arith.mulf %139, %138 : vector<8x128xf32>
    %141 = math.tanh %140 : vector<8x128xf32>
    %cst_48 = arith.constant 1.000000e+00 : f32
    %142 = vector.broadcast %cst_48 : f32 to vector<8x128xf32>
    %143 = arith.addf %142, %141 : vector<8x128xf32>
    %144 = arith.mulf %133, %143 : vector<8x128xf32>
    %145 = arith.truncf %144 : vector<8x128xf32> to vector<8x128xbf16>
    %c0_49 = arith.constant 0 : index
    %c0_50 = arith.constant 0 : index
    %146 = vector.load %arg9[%c0_49, %c0_50] : memref<128x32xbf16, #tpu.memory_space<vmem>>, vector<128x32xbf16>
    %cst_51 = arith.constant dense<0.000000e+00> : vector<8x32xf32>
    %147 = tpu.matmul %145, %146, %cst_51 {dimension_numbers = #tpu.dot_dimension_numbers<[1], [0], [0], [1], [0, 0, 1, 1], [], []>} : vector<8x128xbf16>, vector<128x32xbf16>, vector<8x32xf32> -> vector<8x32xf32>
    %c0_52 = arith.constant 0 : index
    %c0_53 = arith.constant 0 : index
    %148 = vector.load %arg10[%c0_52, %c0_53] : memref<1x32xf32, #tpu.memory_space<vmem>>, vector<1x32xf32>
    %149 = vector.broadcast %148 : vector<1x32xf32> to vector<8x32xf32>
    %150 = arith.addf %147, %149 : vector<8x32xf32>
    %151 = arith.addf %101, %150 : vector<8x32xf32>
    %c0_54 = arith.constant 0 : index
    %c0_55 = arith.constant 0 : index
    %c0_56 = arith.constant 0 : index
    %152 = vector.load %arg15[%c0_54, %c0_55, %c0_56] : memref<1x8x32xf32, #tpu.memory_space<vmem>>, vector<1x8x32xf32>
    %153 = vector.shape_cast %152 : vector<1x8x32xf32> to vector<8x32xf32>
    %154 = vector.shape_cast %151 : vector<8x32xf32> to vector<1x8x32xf32>
    tpu.vector_store %arg15[%c0_54, %c0_55, %c0_56], %154 {strides = array<i32>} : memref<1x8x32xf32, #tpu.memory_space<vmem>>, vector<1x8x32xf32>,
    return
  }
  func.func @transform_0(%arg0: i32) -> (i32, i32, i32) {
    %c0_i32 = arith.constant 0 : i32
    %c0_i32_0 = arith.constant 0 : i32
    %c0_i32_1 = arith.constant 0 : i32
    return %arg0, %c0_i32, %c0_i32_0 : i32, i32, i32
  }
  func.func @transform_1(%arg0: i32) -> (i32, i32) {
    %c0_i32 = arith.constant 0 : i32
    %c0_i32_0 = arith.constant 0 : i32
    %c0_i32_1 = arith.constant 0 : i32
    return %c0_i32, %c0_i32_0 : i32, i32
  }
  func.func @transform_2(%arg0: i32) -> (i32, i32) {
    %c0_i32 = arith.constant 0 : i32
    %c0_i32_0 = arith.constant 0 : i32
    %c0_i32_1 = arith.constant 0 : i32
    return %c0_i32, %c0_i32_0 : i32, i32
  }
  func.func @transform_3(%arg0: i32) -> (i32, i32) {
    %c0_i32 = arith.constant 0 : i32
    %c0_i32_0 = arith.constant 0 : i32
    %c0_i32_1 = arith.constant 0 : i32
    return %c0_i32, %c0_i32_0 : i32, i32
  }
  func.func @transform_4(%arg0: i32) -> (i32, i32) {
    %c0_i32 = arith.constant 0 : i32
    %c0_i32_0 = arith.constant 0 : i32
    %c0_i32_1 = arith.constant 0 : i32
    return %c0_i32, %c0_i32_0 : i32, i32
  }
  func.func @transform_5(%arg0: i32) -> (i32, i32) {
    %c0_i32 = arith.constant 0 : i32
    %c0_i32_0 = arith.constant 0 : i32
    %c0_i32_1 = arith.constant 0 : i32
    return %c0_i32, %c0_i32_0 : i32, i32
  }
  func.func @transform_6(%arg0: i32) -> (i32, i32) {
    %c0_i32 = arith.constant 0 : i32
    %c0_i32_0 = arith.constant 0 : i32
    %c0_i32_1 = arith.constant 0 : i32
    return %c0_i32, %c0_i32_0 : i32, i32
  }
  func.func @transform_7(%arg0: i32) -> (i32, i32) {
    %c0_i32 = arith.constant 0 : i32
    %c0_i32_0 = arith.constant 0 : i32
    %c0_i32_1 = arith.constant 0 : i32
    return %c0_i32, %c0_i32_0 : i32, i32
  }
  func.func @transform_8(%arg0: i32) -> (i32, i32) {
    %c0_i32 = arith.constant 0 : i32
    %c0_i32_0 = arith.constant 0 : i32
    %c0_i32_1 = arith.constant 0 : i32
    return %c0_i32, %c0_i32_0 : i32, i32
  }
  func.func @transform_9(%arg0: i32) -> (i32, i32) {
    %c0_i32 = arith.constant 0 : i32
    %c0_i32_0 = arith.constant 0 : i32
    %c0_i32_1 = arith.constant 0 : i32
    return %c0_i32, %c0_i32_0 : i32, i32
  }
  func.func @transform_10(%arg0: i32) -> (i32, i32) {
    %c0_i32 = arith.constant 0 : i32
    %c0_i32_0 = arith.constant 0 : i32
    %c0_i32_1 = arith.constant 0 : i32
    return %c0_i32, %c0_i32_0 : i32, i32
  }
  func.func @transform_11(%arg0: i32) -> (i32, i32) {
    %c0_i32 = arith.constant 0 : i32
    %c0_i32_0 = arith.constant 0 : i32
    %c0_i32_1 = arith.constant 0 : i32
    return %c0_i32, %c0_i32_0 : i32, i32
  }
  func.func @transform_12(%arg0: i32) -> (i32, i32) {
    %c0_i32 = arith.constant 0 : i32
    %c0_i32_0 = arith.constant 0 : i32
    %c0_i32_1 = arith.constant 0 : i32
    return %c0_i32, %c0_i32_0 : i32, i32
  }
  func.func @transform_13(%arg0: i32) -> (i32, i32) {
    %c0_i32 = arith.constant 0 : i32
    %c0_i32_0 = arith.constant 0 : i32
    %c0_i32_1 = arith.constant 0 : i32
    return %c0_i32, %c0_i32_0 : i32, i32
  }
  func.func @transform_14(%arg0: i32) -> (i32, i32, i32) {
    %c0_i32 = arith.constant 0 : i32
    %c0_i32_0 = arith.constant 0 : i32
    %c0_i32_1 = arith.constant 0 : i32
    return %arg0, %c0_i32, %c0_i32_0 : i32, i32, i32
  }
  func.func @transform_15(%arg0: i32) -> (i32, i32, i32, i32) {
    %c0_i32 = arith.constant 0 : i32
    %c0_i32_0 = arith.constant 0 : i32
    %c0_i32_1 = arith.constant 0 : i32
    %c0_i32_2 = arith.constant 0 : i32
    return %arg0, %c0_i32, %c0_i32_0, %c0_i32_1 : i32, i32, i32, i32
  }
}

</mosaic_0001>

<bundles_post_ra>
// kernel: tpu_custom_call.1
= control target key start
LH: loop header
LB: loop body
LE: loop exit
PB: predicated region body
PF: predicated region fallthrough
CT: control target
= control target key end

     0   :  { %s2276_s0 = inlined_call_operand.vmem [shape: f32[2,8,32], index: 0, kind: input, shape index: {}]   ;;  %s2277_s1 = inlined_call_operand.vmem [shape: f32[8,8], index: 1, kind: input, shape index: {}]   ;;  %s2278_s2 = inlined_call_operand.vmem [shape: bf16[32,96], index: 2, kind: input, shape index: {}]   ;;  %s2279_s3 = inlined_call_operand.vmem [shape: f32[1,96], index: 3, kind: input, shape index: {}]   ;;  %s2280_s4 = inlined_call_operand.vmem [shape: bf16[32,32], index: 4, kind: input, shape index: {}]   ;;  %s2281_s5 = inlined_call_operand.vmem [shape: f32[1,32], index: 5, kind: input, shape index: {}]   ;;  %s2282_s6 = inlined_call_operand.vmem [shape: bf16[32,128], index: 6, kind: input, shape index: {}]   ;;  %s2283_s7 = inlined_call_operand.vmem [shape: f32[1,128], index: 7, kind: input, shape index: {}]   ;;  %s2284_s8 = inlined_call_operand.vmem [shape: bf16[128,32], index: 8, kind: input, shape index: {}]   ;;  %s2285_s9 = inlined_call_operand.vmem [shape: f32[1,32], index: 9, kind: input, shape index: {}]   ;;  %s2286_s10 = inlined_call_operand.vmem [shape: f32[1,32], index: 10, kind: input, shape index: {}]   ;;  %s2287_s11 = inlined_call_operand.vmem [shape: f32[1,32], index: 11, kind: input, shape index: {}]   ;;  %s2288_s12 = inlined_call_operand.vmem [shape: f32[1,32], index: 12, kind: input, shape index: {}]   ;;  %s2289_s13 = inlined_call_operand.vmem [shape: f32[1,32], index: 13, kind: input, shape index: {}]   ;;  %s2290_s14 = inlined_call_operand.hbm [shape: f32[2,8,32], index: 14, kind: output, shape index: {0}]   ;;  %s2291_s15 = inlined_call_operand.hbm [shape: bf16[2,4,8,8], index: 15, kind: output, shape index: {1}]  }
   0x1   :  { %2293 = sst [smem:[#allocation8_spill]] %s2276_s0 }
   0x2   :  { %2294 = sst [smem:[#allocation9_spill]] %s2277_s1 }
   0x3   :  { %2295 = sst [smem:[#allocation10_spill]] %s2278_s2 }
   0x4   :  { %2296 = sst [smem:[#allocation11_spill]] %s2279_s3 }
   0x5   :  { %2297 = sst [smem:[#allocation12_spill]] %s2280_s4 }
   0x6   :  { %2298 = sst [smem:[#allocation13_spill]] %s2281_s5 }
   0x7   :  { %2299 = sst [smem:[#allocation14_spill]] %s2282_s6 }
   0x8   :  { %2300 = sst [smem:[#allocation15_spill]] %s2283_s7 }
   0x9   :  { %21 = vsyncpa [#allocation3], 0 }
   0xa   :  { %23 = vsyncpa [#allocation3 + $0x1], 0 }
   0xb   :  { %24 = vsyncpa [#allocation5], 0 }
   0xc   :  { %26 = vsyncpa [#allocation5 + $0x1], 0  ;;  %s1941_s18 = smov 0   ;;  %s1943_s19 = smov 0  }
   0xd   :  { %s1945_s20 = smov 0   ;;  %s1947_s21 = smov 0  }
   0xe LB: > { %s1962_s22 = sadd.s32 4294967295, %s1846_s21   ;;  %s1487_s23 = sadd.s32 4294967294, %s1846_s21   ;;  %s1846_s21 = sphi %s1947_s21, %s2316_s21   ;;  %s1842_s20 = sphi %s1945_s20, %s2315_s20   ;;  %s1838_s19 = sphi %s1943_s19, %s2314_s19   ;;  %s1834_s18 = sphi %s1941_s18, %s2313_s18  }
   0xf   : > { %s1966_s24 = sadd.s32 1, %s1846_s21   ;;  %s338_s25 = sadd.s32 1, %s1842_s20 }
  0x10   : > { %s335_s26 = ssub.s32 %s1846_s21, %s1966_s24  ;;  %p348_p0 = scmp.ne.s32.totalorder %s1842_s20, %s1838_s19 }
  0x11   : > { %p336_p1 = scmp.eq.s32.totalorder %s335_s26, 0  ;;  %p349_p2 = scmp.eq.s32.totalorder %s1962_s22, 1 }
  0x12   : > { %p354_p3 = scmp.ne.s32.totalorder %s1838_s19, %s1834_s18  ;;  %p355_p4 = scmp.eq.s32.totalorder %s1487_s23, 1 }
  0x13   : > { %s1977_s27 = scalar_select %p336_p1, %s1842_s20, %s338_s25  }
  0x14   : > { %p1979_p5 = por %p349_p2, %p348_p0  ;;  %p1983_p6 = por %p355_p4, %p354_p3 }
  0x15   : > { %p1490_p7 = scmp.ge.s32.totalorder %s1846_s21, 1  ;;  %p445_p8 = scmp.lt.s32.totalorder %s1846_s21, 3 }
  0x17   : > { %p446_p9 = pnand %p1490_p7, %p445_p8 }
  0x18   : > { %p497_p10 = scmp.lt.s32.totalorder (!%p446_p9), %s1962_s22, 1  ;;  %vm506_vm0 = vcmask (!%p446_p9), 261120   ;;  %s2303_s0 = sld [smem:[#allocation8_spill]] (!%p446_p9)  ;;  %v1848_v8 = vmov (!%p446_p9), 0.0   ;;  %vm1849_vm1 = vmmov (!%p446_p9), 0   ;;  %vm612_vm2 = vcmask (!%p446_p9), 64512  }
  0x19   : > { %449 = sbr.rel (%p446_p9) target bundleno = 2679 (0xa77), region = 76  ;;  %s2304_s2 = sld [smem:[#allocation10_spill]] (!%p446_p9)  ;;  %1569 = vmatprep.subr.bf16.mxu0 (!%p446_p9), %v1848_v8  ;;  %1573 = vmatprep.mubr.msk.bf16.mxu0 (!%p446_p9), %vm1849_vm1, %v1848_v8  ;;  %v1494_v14 = vld [vmem:[%s2286_s10] ss:$0 sm:$0xff] (!%p446_p9)  ;;  %vm869_vm3 = vcmask (!%p446_p9), 1043456   ;;  %vm859_vm4 = vcmask (!%p446_p9), 60416  }
  0x1a   : > { %1589 = vmatprep.subr.bf16.mxu1 (!%p446_p9), %v1848_v8  ;;  %1591 = vmatprep.mubr.msk.bf16.mxu1 (!%p446_p9), %vm1849_vm1, %v1848_v8  ;;  %v1495_v16 = vld [vmem:[%s2287_s11] ss:$0 sm:$0xff] (!%p446_p9)  ;;  %s2305_s3 = sld [smem:[#allocation11_spill]] (!%p446_p9)  ;;  %s1850_s23 = smov (!%p446_p9), 104   ;;  %vm1070_vm5 = vcmask (!%p446_p9), 130048   ;;  %vm1072_vm6 = vcmask (!%p446_p9), 195584  }
  0x1b   : > { %s1852_s26 = smov (!%p446_p9), 112   ;;  %s2306_s1 = sld [smem:[#allocation9_spill]] (!%p446_p9) }
  0x1c   : > { %s2307_s4 = sld [smem:[#allocation12_spill]] (!%p446_p9)  ;;  %s2308_s5 = sld [smem:[#allocation13_spill]] (!%p446_p9) }
  0x1d   : > { %s2309_s6 = sld [smem:[#allocation14_spill]] (!%p446_p9)  ;;  %s2310_s7 = sld [smem:[#allocation15_spill]] (!%p446_p9) }
  0x1f   : > { %v1716_v7 = vld [vmem:[%s2304_s2] sm:$0xff] (!%p446_p9)   ;;  %v1717_v9 = vld [vmem:[%s2304_s2 + $0x8] sm:$0xff] (!%p446_p9)  }
  0x20   : > { %s498_s30 = scalar_select %p497_p10, %s1962_s22, 1  ;;  %1570 = vmatpush3.bf16.msra.mxu0 %v1716_v7  ;;  %v1496_v20 = vld [vmem:[%s2305_s3] ss:$0 sm:$0xff] }
  0x21   : > { %1571 = vmatprep.subr.bf16.mxu0 %v1848_v8  ;;  %v503_v39 = vld [vmem:[%s2306_s1] sm:$0xff]  ;;  %s1856_s1 = smov 16  }
  0x22   : > { %s1493_s16 = sshll.u32 %s498_s30, 3  ;;  %s1853_s30 = smov 96  }
  0x23   : > { %s500_s25 = scalar_lea.vmem %s2303_s0, %s1493_s16  ;;  %s1855_s0 = smov 8  }
  0x24   : > { %v1994_v0 = vld [vmem:[%s500_s25] sm:$0xff]  ;;  %1572 = vmatpush3.bf16.msra.mxu0 %v1717_v9  ;;  %s1851_s25 = smov 120   ;;  %s1857_s16 = smov 24  }
  0x25   : > { %v507_v1 = vsel %vm506_vm0, %v1994_v0, 0.0  ;;  %1577 = vmatprep.subr.bf16.mxu0 %v1848_v8 }
  0x26   : > { %508 = vadd.xlane.f32.xlu0 %v507_v1 }
  0xb3   : > { %v509_v2 = vpop.xlane.xlu0 %508 }
  0xb4   : > { %v511_v3 = vmul.f32 0.03125, %v509_v2 }
  0xb6   : > { %v512_v4 = vsub.f32 %v1994_v0, %v511_v3 }
  0xb8   : > { %v513_v5 = vmul.f32 %v512_v4, %v512_v4 }
  0xba   : > { %v514_v6 = vsel %vm506_vm0, %v513_v5, 0.0 }
  0xbb   : > { %515 = vadd.xlane.f32.xlu0 %v514_v6 }
 0x148   : > { %v516_v10 = vpop.xlane.xlu0 %515 }
 0x149   : > { %v517_v11 = vmul.f32 0.03125, %v516_v10 }
 0x14b   : > { %v518_v12 = vadd.f32 1e-05, %v517_v11 }
 0x14d   : > { %1730 = vrsqrt.f32 %v518_v12 }
 0x157   : > { %v1731_v13 = vpop.eup %1730 }
 0x158   : > { %v520_v15 = vmul.f32 %v1731_v13, %v512_v4 }
 0x15a   : > { %v527_v17 = vmul.f32 %v1494_v14, %v520_v15 }
 0x15c   : > { %v534_v18 = vadd.f32 %v1495_v16, %v527_v17 }
 0x15e   : > { %v535_v19 = vpack.c.bf16 %v534_v18, %v534_v18 }
 0x160   : > { %1574 = vmatmul.mubr.msk.bf16.vlgmr.msra.gmra.mrb[0].mxu0 %vm506_vm0, %v535_v19 }
 0x161   : > { %1579 = vmatprep.mubr.msk.bf16.mxu0 %vm1849_vm1, %v1848_v8 }
 0x233   : > { %v596_v21 = vpop.f32.mrb[0].mxu0 }
 0x234   : > { %v597_v22 = vadd.f32 %v1496_v20, %v596_v21  ;;  %v1575_v23 = vpop.f32.mrb[1].mxu0 }
 0x235   : > { %v599_v24 = vpop.f32.mrb[2].mxu0 }
 0x236   : > { %v2026_v25 = vpack.c.bf16 %v597_v22, %v597_v22  ;;  %v1576_v26 = vpop.f32.mrb[3].mxu0 }
 0x238   : > { %608 = vrot.lane.b32.xlu0 %v2026_v25, %s1850_s23  ;;  %604 = vrot.lane.b32.xlu1 %v2026_v25, %s1851_s25  ;;  %s2292_s23 = smov 64   ;;  %s2087_s25 = sand.u32 1, %s1838_s19  }
 0x23c   : > { %606 = vrot.lane.b32.xlu1 %v2026_v25, %s1852_s26  ;;  %s1492_s26 = sshll.u32 %s2087_s25, 4 }
 0x240   : > { %610 = vrot.lane.b32.xlu1 %v2026_v25, %s1853_s30 }
 0x2aa   : > { %v2032_v27 = vpop.permute.xlu1 %604  ;;  %v2038_v29 = vpop.permute.xlu0 %608 }
 0x2ab   : > { %659 = vrot.lane.b32.xlu1 %v2032_v27, %s1853_s30 }
 0x2ae   : > { %v2035_v28 = vpop.permute.xlu1 %606 }
 0x2af   : > { %707 = vrot.lane.b32.xlu1 %v2035_v28, %s1853_s30 }
 0x2b2   : > { %v611_v30 = vpop.permute.xlu1 %610 }
 0x2b3   : > { %v617_v31 = vsel %vm612_vm2, %v611_v30, 0  ;;  %755 = vrot.lane.b32.xlu1 %v2038_v29, %s1853_s30  ;;  %s2091_s30 = scalar_lea.vmem [#allocation4], %s1492_s26 }
 0x2b4   : > { %1578 = vmatpush3.bf16.xpose.msra.mxu0 %v617_v31 }
 0x2b5   : > { %1583 = vmatprep.subr.bf16.mxu0 %v1848_v8 }
 0x2bb   : > { %1580 = vmatmul.mubr.msk.bf16.vlgmr.msra.gmra.mrb[4].mxu0 %vm612_vm2, %v2026_v25 }
 0x2bc   : > { %1585 = vmatprep.mubr.msk.bf16.mxu0 %vm1849_vm1, %v1848_v8 }
 0x31d   : > { %v660_v32 = vpop.permute.xlu1 %659 }
 0x31e   : > { %v665_v33 = vsel %vm612_vm2, %v660_v32, 0 }
 0x31f   : > { %1584 = vmatpush3.bf16.xpose.msra.mxu0 %v665_v33 }
 0x320   : > { %1595 = vmatprep.subr.bf16.mxu0 %v1848_v8 }
 0x321   : > { %v708_v34 = vpop.permute.xlu1 %707 }
 0x322   : > { %v713_v35 = vsel %vm612_vm2, %v708_v34, 0 }
 0x323   : > { %1590 = vmatpush3.bf16.xpose.msra.mxu1 %v713_v35 }
 0x324   : > { %1601 = vmatprep.subr.bf16.mxu1 %v1848_v8 }
 0x325   : > { %v756_v36 = vpop.permute.xlu1 %755 }
 0x326   : > { %v761_v37 = vsel %vm612_vm2, %v756_v36, 0  ;;  %1586 = vmatmul.mubr.msk.bf16.vlgmr.msra.gmra.mrb[8].mxu0 %vm612_vm2, %v2032_v27 }
 0x327   : > { %1596 = vmatpush3.bf16.xpose.msra.mxu0 %v761_v37  ;;  %1597 = vmatprep.mubr.msk.bf16.mxu0 %vm1849_vm1, %v1848_v8 }
 0x328   : > { %1607 = vmatprep.subr.bf16.mxu0 %v1848_v8 }
 0x32a   : > { %1592 = vmatmul.mubr.msk.bf16.vlgmr.msra.gmra.mrb[0].mxu1 %vm612_vm2, %v2035_v28 }
 0x32b   : > { %1603 = vmatprep.mubr.msk.bf16.mxu1 %vm1849_vm1, %v1848_v8 }
 0x32e   : > { %1598 = vmatmul.mubr.msk.bf16.vlgmr.msra.gmra.mrb[12].mxu0 %vm612_vm2, %v2038_v29 }
 0x32f   : > { %1609 = vmatprep.mubr.msk.bf16.mxu0 %vm1849_vm1, %v1848_v8 }
 0x38e   : > { %v653_v38 = vpop.f32.mrb[4].mxu0 }
 0x38f   : > { %v803_v40 = vmul.f32 0.35355338, %v653_v38  ;;  %v1581_v41 = vpop.f32.mrb[5].mxu0 }
 0x390   : > { %v656_v42 = vpop.f32.mrb[6].mxu0 }
 0x391   : > { %v1582_v43 = vpop.f32.mrb[7].mxu0  ;;  %v807_v44 = vadd.f32 %v803_v40, %v503_v39 }
 0x393   : > { %v811_v45 = vsel %vm612_vm2, %v807_v44, -inf }
 0x394   : > { %812 = vmax.xlane.f32.xlu1 %v811_v45 }
 0x3f9   : > { %v701_v46 = vpop.f32.mrb[8].mxu0 }
 0x3fa   : > { %v804_v47 = vmul.f32 0.35355338, %v701_v46  ;;  %v1587_v48 = vpop.f32.mrb[9].mxu0 }
 0x3fb   : > { %v704_v49 = vpop.f32.mrb[10].mxu0 }
 0x3fc   : > { %v1588_v50 = vpop.f32.mrb[11].mxu0  ;;  %v808_v51 = vadd.f32 %v804_v47, %v503_v39 }
 0x3fd   : > { %v749_v52 = vpop.f32.mrb[0].mxu1 }
 0x3fe   : > { %v805_v53 = vmul.f32 0.35355338, %v749_v52  ;;  %v1593_v54 = vpop.f32.mrb[1].mxu1  ;;  %v814_v55 = vsel %vm612_vm2, %v808_v51, -inf }
 0x3ff   : > { %v752_v56 = vpop.f32.mrb[2].mxu1  ;;  %815 = vmax.xlane.f32.xlu0 %v814_v55  ;;  %v1719_v54 = vld [vmem:[%s2307_s4 + $0x8] sm:$0xff]  }
 0x400   : > { %v1594_v57 = vpop.f32.mrb[3].mxu1  ;;  %v809_v58 = vadd.f32 %v805_v53, %v503_v39  ;;  %v1718_v53 = vld [vmem:[%s2307_s4] sm:$0xff]  }
 0x401   : > { %v797_v59 = vpop.f32.mrb[12].mxu0 }
 0x402   : > { %v806_v60 = vmul.f32 0.35355338, %v797_v59  ;;  %v1599_v61 = vpop.f32.mrb[13].mxu0  ;;  %v817_v62 = vsel %vm612_vm2, %v809_v58, -inf }
 0x403   : > { %818 = vmax.xlane.f32.xlu1 %v817_v62  ;;  %v800_v63 = vpop.f32.mrb[14].mxu0 }
 0x404   : > { %v1600_v1 = vpop.f32.mrb[15].mxu0  ;;  %v810_v2 = vadd.f32 %v806_v60, %v503_v39 }
 0x406   : > { %v820_v3 = vsel %vm612_vm2, %v810_v2, -inf }
 0x407   : > { %821 = vmax.xlane.f32.xlu0 %v820_v3 }
 0x414   : > { %864 = vrot.lane.b32.xlu1 %v2026_v25, %s2292_s23 }
 0x421   : > { %v813_v4 = vpop.xlane.xlu1 %812 }
 0x422   : > { %v823_v5 = vsub.f32 %v807_v44, %v813_v4 }
 0x424   : > { %v827_v6 = vmul.f32 1.442695, %v823_v5 }
 0x426   : > { %1732 = vpow2.f32 %v827_v6 }
 0x430   : > { %v1733_v7 = vpop.eup %1732 }
 0x431   : > { %v835_v9 = vsel %vm612_vm2, %v1733_v7, 0.0 }
 0x438   : > { %836 = vadd.xlane.f32.xlu1 %v835_v9 }
 0x48c   : > { %v816_v10 = vpop.xlane.xlu0 %815 }
 0x48d   : > { %v824_v11 = vsub.f32 %v808_v51, %v816_v10 }
 0x48f   : > { %v829_v12 = vmul.f32 1.442695, %v824_v11 }
 0x490   : > { %v819_v13 = vpop.xlane.xlu1 %818 }
 0x491   : > { %1734 = vpow2.f32 %v829_v12  ;;  %v825_v14 = vsub.f32 %v809_v58, %v819_v13  ;;  %v1508_v12 = vld [vmem:[%s2308_s5] ss:$0 sm:$0xff] }
 0x493   : > { %v831_v15 = vmul.f32 1.442695, %v825_v14 }
 0x494   : > { %v865_v16 = vpop.permute.xlu1 %864  ;;  %v822_v17 = vpop.xlane.xlu0 %821 }
 0x495   : > { %1736 = vpow2.f32 %v831_v15  ;;  %v871_v18 = vsel %vm869_vm3, %v865_v16, 0  ;;  %v826_v19 = vsub.f32 %v810_v2, %v822_v17 }
 0x496   : > { %1602 = vmatpush3.bf16.msra.mxu1 %v871_v18 }
 0x497   : > { %v833_v20 = vmul.f32 1.442695, %v826_v19  ;;  %1613 = vmatprep.subr.bf16.mxu1 %v1848_v8 }
 0x499   : > { %1738 = vpow2.f32 %v833_v20 }
 0x49b   : > { %v1735_v21 = vpop.eup %1734 }
 0x49c   : > { %v838_v22 = vsel %vm612_vm2, %v1735_v21, 0.0 }
 0x49d   : > { %839 = vadd.xlane.f32.xlu0 %v838_v22 }
 0x49f   : > { %v1737_v23 = vpop.eup %1736 }
 0x4a0   : > { %v841_v24 = vsel %vm612_vm2, %v1737_v23, 0.0 }
 0x4a1   : > { %842 = vadd.xlane.f32.xlu1 %v841_v24 }
 0x4a3   : > { %v1739_v25 = vpop.eup %1738 }
 0x4a4   : > { %v844_v26 = vsel %vm612_vm2, %v1739_v25, 0.0 }
 0x4a5   : > { %845 = vadd.xlane.f32.xlu0 %v844_v26  ;;  %v1722_v26 = vld [vmem:[%s2284_s8] sm:$0xff]  }
 0x4b2   : > { %961 = vrot.lane.b32.xlu1 %v2035_v28, %s2292_s23 }
 0x4b6   : > { %1009 = vrot.lane.b32.xlu1 %v2038_v29, %s2292_s23 }
 0x4bb   : > { %913 = vrot.lane.b32.xlu0 %v2032_v27, %s2292_s23 }
 0x4c5   : > { %v837_v30 = vpop.xlane.xlu1 %836 }
 0x4c6   : > { %1740 = vrcp.f32 %v837_v30 }
 0x4d0   : > { %v1741_v31 = vpop.eup %1740 }
 0x4d1   : > { %v851_v32 = vmul.f32 %v1741_v31, %v1733_v7 }
 0x4d3   : > { %v855_v33 = vpack.c.bf16 %v851_v32, %v851_v32 }
 0x4d5   : > { %1604 = vmatmul.mubr.msk.bf16.vlgmr.msra.gmra.mrb[4].mxu1 %vm612_vm2, %v855_v33  ;;  %860 = vst.msk [vmem:[%s2091_s30] sm:$0xf] %vm859_vm4, %v855_v33 }
 0x4d6   : > { %1615 = vmatprep.mubr.msk.bf16.mxu1 %vm1849_vm1, %v1848_v8 }
 0x52a   : > { %v840_v27 = vpop.xlane.xlu0 %839 }
 0x52b   : > { %1742 = vrcp.f32 %v840_v27  ;;  %v1512_v27 = vld [vmem:[%s2288_s12] ss:$0 sm:$0xff] }
 0x52e   : > { %v843_v28 = vpop.xlane.xlu1 %842 }
 0x52f   : > { %1744 = vrcp.f32 %v843_v28 }
 0x532   : > { %v962_v29 = vpop.permute.xlu1 %961  ;;  %v846_v34 = vpop.xlane.xlu0 %845 }
 0x533   : > { %v967_v35 = vsel %vm869_vm3, %v962_v29, 0  ;;  %1746 = vrcp.f32 %v846_v34  ;;  %v1513_v29 = vld [vmem:[%s2289_s13] ss:$0 sm:$0xff] }
 0x534   : > { %1614 = vmatpush3.bf16.msra.mxu1 %v967_v35 }
 0x535   : > { %v1743_v36 = vpop.eup %1742  ;;  %1625 = vmatprep.subr.bf16.mxu1 %v1848_v8 }
 0x536   : > { %v852_v37 = vmul.f32 %v1743_v36, %v1735_v21  ;;  %v914_v38 = vpop.permute.xlu0 %913  ;;  %v1010_v40 = vpop.permute.xlu1 %1009 }
 0x537   : > { %v919_v39 = vsel %vm869_vm3, %v914_v38, 0  ;;  %v1015_v44 = vsel %vm869_vm3, %v1010_v40, 0  ;;  %v1724_v38 = vld [vmem:[%s2284_s8 + $0x10] sm:$0xff]   ;;  %v1726_v40 = vld [vmem:[%s2284_s8 + $0x20] sm:$0xff]  }
 0x538   : > { %1608 = vmatpush3.bf16.msra.mxu0 %v919_v39  ;;  %v856_v41 = vpack.c.bf16 %v852_v37, %v852_v37  ;;  %v1723_v37 = vld [vmem:[%s2284_s8 + $0x8] sm:$0xff]   ;;  %v1725_v39 = vld [vmem:[%s2284_s8 + $0x18] sm:$0xff]  }
 0x539   : > { %v1745_v42 = vpop.eup %1744  ;;  %1619 = vmatprep.subr.bf16.mxu0 %v1848_v8 }
 0x53a   : > { %v853_v43 = vmul.f32 %v1745_v42, %v1737_v23  ;;  %861 = vst.msk [vmem:[%s2091_s30 + $0x4] sm:$0xf] %vm859_vm4, %v856_v41  ;;  %v1728_v42 = vld [vmem:[%s2284_s8 + $0x30] sm:$0xff]  }
 0x53b   : > { %1610 = vmatmul.mubr.msk.bf16.vlgmr.msra.gmra.mrb[16].mxu0 %vm612_vm2, %v856_v41  ;;  %v1727_v41 = vld [vmem:[%s2284_s8 + $0x28] sm:$0xff]  }
 0x53c   : > { %1620 = vmatpush3.bf16.msra.mxu0 %v1015_v44  ;;  %v857_v45 = vpack.c.bf16 %v853_v43, %v853_v43  ;;  %1621 = vmatprep.mubr.msk.bf16.mxu0 %vm1849_vm1, %v1848_v8  ;;  %v1729_v43 = vld [vmem:[%s2284_s8 + $0x38] sm:$0xff]   ;;  %v1514_v44 = vld [vmem:[%s2310_s7] ss:$0 sm:$0xff] }
 0x53d   : > { %v1747_v46 = vpop.eup %1746  ;;  %1633 = vmatprep.subr.bf16.mxu0 %v1848_v8 }
 0x53e   : > { %v854_v47 = vmul.f32 %v1747_v46, %v1739_v25  ;;  %1616 = vmatmul.mubr.msk.bf16.vlgmr.msra.gmra.mrb[8].mxu1 %vm612_vm2, %v857_v45  ;;  %862 = vst.msk [vmem:[%s2091_s30 + $0x8] sm:$0xf] %vm859_vm4, %v857_v45  ;;  %v1720_v25 = vld [vmem:[%s2309_s6] sm:$0xff]  }
 0x53f   : > { %1629 = vmatprep.mubr.msk.bf16.mxu1 %vm1849_vm1, %v1848_v8  ;;  %1626 = vmatpush3.bf16.msra.mxu1 %v1718_v53 }
 0x540   : > { %v858_v48 = vpack.c.bf16 %v854_v47, %v854_v47  ;;  %1627 = vmatprep.subr.bf16.mxu1 %v1848_v8 }
 0x542   : > { %863 = vst.msk [vmem:[%s2091_s30 + $0xc] sm:$0xf] %vm859_vm4, %v858_v48 }
 0x543   : > { %1622 = vmatmul.mubr.msk.bf16.vlgmr.msra.gmra.mrb[20].mxu0 %vm612_vm2, %v858_v48  ;;  %1628 = vmatpush3.bf16.msra.mxu1 %v1719_v54 }
 0x544   : > { %1637 = vmatprep.mubr.msk.bf16.mxu0 %vm1849_vm1, %v1848_v8  ;;  %1641 = vmatprep.subr.bf16.mxu1 %v1848_v8 }
 0x545   : > { %1634 = vmatpush3.bf16.msra.mxu0 %v1720_v25 }
 0x546   : > { %1635 = vmatprep.subr.bf16.mxu0 %v1848_v8 }
 0x5a8   : > { %v907_v49 = vpop.f32.mrb[4].mxu1 }
 0x5a9   : > { %v1605_v50 = vpop.f32.mrb[5].mxu1 }
 0x5aa   : > { %v910_v51 = vpop.f32.mrb[6].mxu1 }
 0x5ab   : > { %v1606_v52 = vpop.f32.mrb[7].mxu1 }
 0x60e   : > { %v955_v55 = vpop.f32.mrb[16].mxu0 }
 0x60f   : > { %1058 = vrot.lane.b32.xlu0 %v955_v55, %s1855_s0  ;;  %v1611_v56 = vpop.f32.mrb[17].mxu0  ;;  %s1393_s0 = sshll.u32 %s2091_s30, 4  ;;  %s2190_s0 = int_to_ptr.vmem [resolvable:$true] %s1393_s0 }
 0x610   : > { %v958_v57 = vpop.f32.mrb[18].mxu0  ;;  %s1752_s26 = scalar_lea.vmem %s2190_s0, 256 }
 0x611   : > { %v1612_v58 = vpop.f32.mrb[19].mxu0  ;;  %v1003_v59 = vpop.f32.mrb[8].mxu1  ;;  %p1753_p11 = scmp.ne.s32.totalorder %s2190_s0, %s1752_s26 }
 0x612   : > { %1062 = vrot.lane.b32.xlu1 %v1003_v59, %s1856_s1  ;;  %v1617_v60 = vpop.f32.mrb[9].mxu1  ;;  %s1534_s1 = sshll.u32 %s1962_s22, 8 }
 0x613   : > { %v1006_v61 = vpop.f32.mrb[10].mxu1  ;;  %s2195_s17 = scalar_lea.hbm %s2291_s15, %s1534_s1  ;;  %p1754_p12 = pnand %p1753_p11, %p1979_p5 }
 0x614   : > { %v1618_v62 = vpop.f32.mrb[11].mxu1 }
 0x615   : > { %p1755_p13 = pneg %p1754_p12 }
 0x616   : > { %v1051_v63 = vpop.f32.mrb[20].mxu0 }
 0x617   : > { %1066 = vrot.lane.b32.xlu0 %v1051_v63, %s1857_s16  ;;  %v1623_v1 = vpop.f32.mrb[21].mxu0  ;;  %s1858_s16 = smov [#allocation4]  }
 0x618   : > { %v1054_v2 = vpop.f32.mrb[22].mxu0  ;;  %s1756_s4 = sshll.u32 %s1858_s16, 4  ;;  %s1757_s4 = int_to_ptr.vmem [resolvable:$false] %s1756_s4 }
 0x619   : > { %v1624_v3 = vpop.f32.mrb[23].mxu0  ;;  %s1758_s30 = scalar_lea.vmem %s1757_s4, 512  ;;  %p1759_p0 = scmp.lt.s32.totalorder %s2190_s0, %s1757_s4 }
 0x61a   : > { %p1760_p1 = scmp.lt.s32.totalorder %s1758_s30, %s1752_s26 }
 0x61c   : > { %p1761_p2 = por %p1760_p1, %p1759_p0 }
 0x61e   : > { %p1762_p3 = pnand %p1761_p2, %p1755_p13 }
 0x681   : > { %v1059_v4 = vpop.permute.xlu0 %1058 }
 0x682   : > { %v1069_v6 = vsel %vm612_vm2, %v907_v49, %v1059_v4 }
 0x684   : > { %v1063_v5 = vpop.permute.xlu1 %1062 }
 0x685   : > { %v1071_v7 = vsel %vm1070_vm5, %v1069_v6, %v1063_v5 }
 0x689   : > { %v1067_v9 = vpop.permute.xlu0 %1066 }
 0x68a   : > { %v1073_v10 = vsel %vm1072_vm6, %v1071_v7, %v1067_v9 }
 0x68b   : > { %v1074_v11 = vpack.c.bf16 %v1073_v10, %v1073_v10 }
 0x68d   : > { %1630 = vmatmul.mubr.msk.bf16.vlgmr.msra.gmra.mrb[12].mxu1 %vm506_vm0, %v1074_v11 }
 0x68e   : > { %1657 = vmatprep.mubr.msk.bf16.mxu1 %vm1849_vm1, %v1848_v8  ;;  %1642 = vmatpush3.bf16.msra.mxu1 %v1722_v26 }
 0x68f   : > { %1643 = vmatprep.subr.bf16.mxu1 %v1848_v8 }
 0x692   : > { %1644 = vmatpush3.bf16.msra.mxu1 %v1723_v37 }
 0x693   : > { %1645 = vmatprep.subr.bf16.mxu1 %v1848_v8 }
 0x696   : > { %1646 = vmatpush3.bf16.msra.mxu1 %v1724_v38 }
 0x697   : > { %1647 = vmatprep.subr.bf16.mxu1 %v1848_v8 }
 0x69a   : > { %1648 = vmatpush3.bf16.msra.mxu1 %v1725_v39 }
 0x69b   : > { %1649 = vmatprep.subr.bf16.mxu1 %v1848_v8 }
 0x69e   : > { %1650 = vmatpush3.bf16.msra.mxu1 %v1726_v40 }
 0x69f   : > { %1651 = vmatprep.subr.bf16.mxu1 %v1848_v8 }
 0x6a2   : > { %1652 = vmatpush3.bf16.msra.mxu1 %v1727_v41 }
 0x6a3   : > { %1653 = vmatprep.subr.bf16.mxu1 %v1848_v8 }
 0x6a6   : > { %1654 = vmatpush3.bf16.msra.mxu1 %v1728_v42 }
 0x6a7   : > { %1655 = vmatprep.subr.bf16.mxu1 %v1848_v8 }
 0x6aa   : > { %1656 = vmatpush3.bf16.msra.mxu1 %v1729_v43 }
 0x760   : > { %v1135_v13 = vpop.f32.mrb[12].mxu1 }
 0x761   : > { %v1136_v14 = vadd.f32 %v1508_v12, %v1135_v13  ;;  %v1631_v15 = vpop.f32.mrb[13].mxu1 }
 0x762   : > { %v1138_v16 = vpop.f32.mrb[14].mxu1 }
 0x763   : > { %v2134_v17 = vadd.f32 %v1136_v14, %v1994_v0  ;;  %v1632_v18 = vpop.f32.mrb[15].mxu1  ;;  %v1721_v0 = vld [vmem:[%s2309_s6 + $0x8] sm:$0xff]  }
 0x764   : > { %1636 = vmatpush3.bf16.msra.mxu0 %v1721_v0 }
 0x765   : > { %v1144_v19 = vsel %vm506_vm0, %v2134_v17, 0.0 }
 0x766   : > { %1145 = vadd.xlane.f32.xlu1 %v1144_v19 }
 0x7f3   : > { %v1146_v20 = vpop.xlane.xlu1 %1145 }
 0x7f4   : > { %v1147_v21 = vmul.f32 0.03125, %v1146_v20 }
 0x7f6   : > { %v1148_v22 = vsub.f32 %v2134_v17, %v1147_v21 }
 0x7f8   : > { %v1149_v23 = vmul.f32 %v1148_v22, %v1148_v22 }
 0x7fa   : > { %v1150_v24 = vsel %vm506_vm0, %v1149_v23, 0.0 }
 0x7fb   : > { %1151 = vadd.xlane.f32.xlu0 %v1150_v24 }
 0x888   : > { %v1152_v30 = vpop.xlane.xlu0 %1151 }
 0x889   : > { %v1153_v31 = vmul.f32 0.03125, %v1152_v30 }
 0x88b   : > { %v1154_v32 = vadd.f32 1e-05, %v1153_v31 }
 0x88d   : > { %1748 = vrsqrt.f32 %v1154_v32 }
 0x897   : > { %v1749_v33 = vpop.eup %1748 }
 0x898   : > { %v1156_v28 = vmul.f32 %v1749_v33, %v1148_v22 }
 0x89a   : > { %v1163_v34 = vmul.f32 %v1512_v27, %v1156_v28 }
 0x89c   : > { %v1170_v35 = vadd.f32 %v1513_v29, %v1163_v34 }
 0x89e   : > { %v1171_v36 = vpack.c.bf16 %v1170_v35, %v1170_v35 }
 0x8a0   : > { %1638 = vmatmul.mubr.msk.bf16.vlgmr.msra.gmra.mrb[24].mxu0 %vm506_vm0, %v1171_v36 }
 0x973   : > { %v1232_v45 = vpop.f32.mrb[24].mxu0 }
 0x974   : > { %v1233_v46 = vadd.f32 %v1514_v44, %v1232_v45  ;;  %v1639_v47 = vpop.f32.mrb[25].mxu0 }
 0x975   : > { %v1235_v48 = vpop.f32.mrb[26].mxu0 }
 0x976   : > { %v1239_v49 = vmul.f32 0.044715, %v1233_v46  ;;  %v1640_v50 = vpop.f32.mrb[27].mxu0  ;;  %v1238_v55 = vmul.f32 0.5, %v1233_v46 }
 0x978   : > { %v1240_v51 = vmul.f32 %v1239_v49, %v1233_v46 }
 0x97a   : > { %v1241_v52 = vmul.f32 %v1240_v51, %v1233_v46 }
 0x97c   : > { %v1242_v53 = vadd.f32 %v1241_v52, %v1233_v46 }
 0x97e   : > { %v1243_v54 = vmul.f32 0.7978846, %v1242_v53 }
 0x980   : > { %1750 = vtanh.f32 %v1243_v54 }
 0x98a   : > { %v1751_v8 = vpop.eup %1750 }
 0x98b   : > { %v1245_v56 = vadd.f32 1.0, %v1751_v8 }
 0x98d   : > { %v1246_v57 = vmul.f32 %v1245_v56, %v1238_v55 }
 0x98f   : > { %v1247_v58 = vpack.c.bf16 %v1246_v57, %v1246_v57 }
 0x991   : > { %1658 = vmatmul.mubr.bf16.vlgmr.msra.gmra.mrb[16].mxu1 %v1247_v58 }
 0x992   : > { %1765 = shalt.err (!%p1762_p3)
}
 0x993   : > { %s1766_s1 = scalar_lea.hbm %s2195_s17, 256  ;;  %s1770_s16 = scalar_lea.hbm %s2291_s15, 512 }
 0x994   : > { %p1767_p4 = scmp.ne.s32.totalorder %s2195_s17, %s1766_s1  ;;  %p1771_p9 = scmp.lt.u32.totalorder %s2195_s17, %s2291_s15 }
 0x995   : > { %p1772_p10 = scmp.lt.u32.totalorder %s1770_s16, %s1766_s1  ;;  %p1774_p12 = scmp.lt.u32.totalorder %s1766_s1, %s2195_s17 }
 0x996   : > { %p1768_p7 = pnand %p1767_p4, %p1979_p5 }
 0x997   : > { %p1773_p11 = por %p1772_p10, %p1771_p9 }
 0x998   : > { %p1769_p8 = pneg %p1768_p7 }
 0x999   : > { %p1775_p13 = por %p1774_p12, %p1773_p11 }
 0x99b   : > { %p1776_p0 = pnand %p1775_p13, %p1769_p8 }
 0x99d   : > { %1779 = shalt.err (!%p1776_p0)
}
 0x99e   : > { %s1859_s26 = smov 4   ;;  %s2311_s30 = smov 64   ;;  %v1518_v59 = vld [vmem:[%s2285_s9] ss:$0 sm:$0xff] }
 0x99f   : > { %s2312_s5 = scalar_lea.sflag [#allocation5], %s2087_s25  ;;  %s1491_s3 = sshll.u32 %s2087_s25, 3 }
 0x9a0   : > { %1662 = dma.vmem_to_hbm [thread:$0]  (%p1979_p5), %s2190_s0, 256, %s2195_s17, %s2312_s5, %s2311_s30, %s2311_s30, %s1859_s26  }
 0x9a1   : > { %s1529_s1 = sshll.u32 %s1962_s22, 7  ;;  %s489_s16 = scalar_lea.vmem [#allocation2], %s1491_s3 }
 0x9a2   : > { %s1380_s4 = sshll.u32 %s489_s16, 4  ;;  %s2232_s5 = scalar_lea.hbm %s2290_s14, %s1529_s1  ;;  %s2234_s4 = int_to_ptr.vmem [resolvable:$true] %s1380_s4 }
 0x9a3   : > { %s1362_s22 = scalar_lea.sflag [#allocation3], %s2087_s25  ;;  %s1780_s0 = scalar_lea.vmem %s2234_s4, 128 }
 0x9a4   : > { %p1781_p1 = scmp.ne.s32.totalorder %s2234_s4, %s1780_s0  ;;  %s1860_s17 = smov [#allocation2]  }
 0x9a5   : > { %s1784_s26 = sshll.u32 %s1860_s17, 4  ;;  %s1785_s26 = int_to_ptr.vmem [resolvable:$false] %s1784_s26 }
 0x9a6   : > { %p1782_p2 = pnand %p1781_p1, %p1979_p5  ;;  %s1786_s30 = scalar_lea.vmem %s1785_s26, 256 }
 0x9a7   : > { %p1787_p4 = scmp.lt.s32.totalorder %s2234_s4, %s1785_s26  ;;  %p1788_p7 = scmp.lt.s32.totalorder %s1786_s30, %s1780_s0 }
 0x9a8   : > { %p1783_p3 = pneg %p1782_p2 }
 0x9a9   : > { %p1789_p8 = por %p1788_p7, %p1787_p4 }
 0x9ab   : > { %p1790_p9 = pnand %p1789_p8, %p1783_p3 }
 0xa64   : > { %v1353_v60 = vpop.f32.mrb[16].mxu1 }
 0xa65   : > { %v1354_v61 = vadd.f32 %v1518_v59, %v1353_v60  ;;  %v1659_v62 = vpop.f32.mrb[17].mxu1 }
 0xa66   : > { %v1356_v63 = vpop.f32.mrb[18].mxu1 }
 0xa67   : > { %v1359_v1 = vadd.f32 %v1354_v61, %v2134_v17  ;;  %v1660_v2 = vpop.f32.mrb[19].mxu1 }
 0xa69   : > { %1360 = vst.msk [vmem:[%s489_s16] sm:$0xff] %vm506_vm0, %v1359_v1 }
 0xa6a   : > { %1793 = shalt.err (!%p1790_p9)
}
 0xa6b   : > { %s1794_s6 = scalar_lea.hbm %s2232_s5, 128  ;;  %s1798_s3 = scalar_lea.hbm %s2290_s14, 256 }
 0xa6c   : > { %p1795_p10 = scmp.ne.s32.totalorder %s2232_s5, %s1794_s6  ;;  %p1799_p13 = scmp.lt.u32.totalorder %s2232_s5, %s2290_s14 }
 0xa6d   : > { %p1800_p0 = scmp.lt.u32.totalorder %s1798_s3, %s1794_s6  ;;  %p1802_p2 = scmp.lt.u32.totalorder %s1794_s6, %s2232_s5 }
 0xa6e   : > { %p1796_p11 = pnand %p1795_p10, %p1979_p5 }
 0xa6f   : > { %p1801_p1 = por %p1800_p0, %p1799_p13 }
 0xa70   : > { %p1797_p12 = pneg %p1796_p11 }
 0xa71   : > { %p1803_p3 = por %p1802_p2, %p1801_p1 }
 0xa73   : > { %p1804_p4 = pnand %p1803_p3, %p1797_p12 }
 0xa75   : > { %1807 = shalt.err (!%p1804_p4)
}
 0xa76   : > { %1661 = dma.vmem_to_hbm [thread:$0]  (%p1979_p5), %s2234_s4, 128, %s2232_s5, %s1362_s22  }
 0xa77 PF: > { %p1672_p7 = scmp.ge.s32.totalorder %s1846_s21, 2  ;;  %s1408_s1 = sand.u32 1, %s1834_s18  }
 0xa78   : > { %s1409_s16 = scalar_lea.sflag [#allocation3], %s1408_s1 }
 0xa79   : > { %p1666_p8 = pnand %p1672_p7, %p1983_p6 }
 0xa7b   : > { %1825 = dma.done.wait (!%p1666_p8), %s1409_s16, 128  }
 0xa7c   : > { %1827 = vsyncadd (!%p1666_p8), %s1409_s16, 4294967168  ;;  %s1418_s0 = scalar_lea.sflag [#allocation5], %s1408_s1 }
 0xa7d   : > { %1829 = dma.done.wait (!%p1666_p8), %s1418_s0, 256  }
 0xa7e   : > { %1831 = vsyncadd (!%p1666_p8), %s1418_s0, 4294967040  ;;  %p29_p5 = scmp.ge.s32.totalorder %s1966_s24, 4   ;;  %s2313_s18 = smov %s1838_s19 }
 0xa7f   : > { %s2314_s19 = smov %s1842_s20  ;;  %s2315_s20 = smov %s1977_s27 }
 0xa80   : > { %s2316_s21 = smov %s1966_s24  ;;  %31 = sbr.rel (!%p29_p5) target bundleno = 14 (0xe), region = 128 }
 0xa87   :  { %1423 = vsyncpa [#allocation3], 1 }
 0xa88   :  { %1425 = vsyncpa [#allocation3 + $0x1], 1 }
 0xa89   :  { %1426 = vsyncpa [#allocation5], 1 }
 0xa8a   :  { %1428 = vsyncpa [#allocation5 + $0x1], 1 }

</bundles_post_ra>
